<compile_context>
chip_gen: v7x
topology: tpu7x:2x2x1
jax: 0.10.0
libtpu: 0.0.40
codegen_flags: <defaults>
</compile_context>

<pallas_src>
import functools
import math

import jax
import jax.numpy as jnp
from jax import lax
from jax.experimental import pallas as pl
from jax.experimental.pallas import tpu as pltpu


# ----------------------------------------------------------------------------- #
# Config helpers: generation-aware VMEM budget and query-tile size
# ----------------------------------------------------------------------------- #
@functools.lru_cache(maxsize=1)
def _vmem_limit_bytes():
    """Scoped-VMEM limit ~= 3/4 of physical VMEM (48 MiB on v7x, 96 MiB on v5e/v6e)."""
    cap = 64 * 1024 * 1024  # conservative fallback (v7x physical)
    try:
        info = pltpu.get_tpu_info()
        cap = int(getattr(info, "vmem_capacity_bytes", cap) or cap)
    except Exception:
        pass
    return (cap * 3) // 4


def _choose_tile_l(B, L):
    """Pick the query-row tile so BT = B*tile_l fills MXU rows (target 128-512), keeps
    >= 2 grid tiles when that still leaves BT >= 128 (v7x megacore), and is a multiple
    of 16 whenever tile_l < L (bf16 sublane packing of Kernel A outputs)."""
    if B * L <= 512:
        if B * L >= 256 and L % 32 == 0:
            return L // 2          # two tiles, BT still >= 128 -> both v7x TCs busy
        return L                   # single full tile (demo shapes land here)
    target = max(16, min(L, 512 // max(B, 1)))
    t = (target // 16) * 16
    while t >= 16 and L % t != 0:
        t -= 16
    return t if t >= 16 else L


# ----------------------------------------------------------------------------- #
# Kernel A: fused Q/K/V projection for all heads (one wide matmul), tiled over seq rows
# ----------------------------------------------------------------------------- #
def qkv_proj_kernel(x_ref, w_ref, b_ref, q_out_ref, k_out_ref, v_out_ref):
    B, TL, H = x_ref.shape
    Dq = q_out_ref.shape[-1]
    Dk = k_out_ref.shape[-1]
    Dv = v_out_ref.shape[-1]

    x2 = x_ref[...].reshape(B * TL, H).astype(jnp.bfloat16)            # bf16 MXU operand
    y = jnp.dot(x2, w_ref[...], preferred_element_type=jnp.float32)    # f32 accumulation
    y = y + b_ref[...]                                                  # fused bias

    q_out_ref[...] = y[:, :Dq].reshape(B, TL, Dq).astype(q_out_ref.dtype)
    k_out_ref[...] = y[:, Dq:Dq + Dk].reshape(B, TL, Dk).astype(k_out_ref.dtype)
    v_out_ref[...] = y[:, Dq + Dk:Dq + Dk + Dv].reshape(B, TL, Dv).astype(v_out_ref.dtype)


# ----------------------------------------------------------------------------- #
# Kernel B: attention (all heads) + fused shrink_head + LN + FFN + LN, tiled over q rows
# ----------------------------------------------------------------------------- #
def attn_ffn_kernel(
    x_ref, maskcol_ref, q_ref, k_ref, v_ref,
    wsh_ref, bsh_ref,
    g1_ref, b1_ref, wf1_ref, bf1_ref, wf2_ref, bf2_ref, g2_ref, b2_ref,
    out_ref,
    *, num_heads, q_size, k_size, v_size,
):
    B, TL, H = x_ref.shape
    L = k_ref.shape[1]
    BT = B * TL

    x2 = x_ref[...].reshape(BT, H)          # f32 residual path
    q_all = q_ref[...]                      # bf16 [B, TL, nH*q], 1/sqrt(dk) pre-folded
    k_all = k_ref[...]                      # bf16 [B, L,  nH*k] (resident)
    v_all = v_ref[...]                      # bf16 [B, L,  nH*v] (resident)

    # Hoist the mask broadcast out of the head loop (broadcast_in_dim is not CSE'd).
    mask_full = jnp.broadcast_to(maskcol_ref[...][:, None, :], (B, TL, L))  # [B, TL, L]

    # Static unroll over heads: per-head intermediates (s/e/p) die each iteration and
    # only the small zh tiles [B, TL, v] stay live for the fused shrink_head matmul.
    # TODO(synk): for large num_heads/L convert to lax.fori_loop(unroll=True) writing zh
    # into a VMEM scratch to bound vreg live ranges.
    z_heads = []
    for h in range(num_heads):
        qh = q_all[:, :, h * q_size:(h + 1) * q_size]                   # [B, TL, q]
        kh = k_all[:, :, h * k_size:(h + 1) * k_size]                   # [B, L,  k]
        vh = v_all[:, :, h * v_size:(h + 1) * v_size]                   # [B, L,  v]

        # Scaling by 1/sqrt(dk) already folded into wq/bq; canonical flash-attn form.
        s = jnp.einsum("bqd,bkd->bqk", qh, kh,
                       preferred_element_type=jnp.float32)              # [B, TL, L]
        s = s * mask_full                    # multiplicative mask, as in the reference

        # torch F.softmax(3-D, no dim) => softmax over dim=0 (batch axis); reproduced.
        m = jnp.max(s, axis=0, keepdims=True)
        e = jnp.exp(s - m)
        denom = jnp.sum(e, axis=0, keepdims=True)     # >= 1, safe for approx reciprocal
        p = e * pl.reciprocal(denom, approx=True)     # EUP, not VPU divide

        zh = jnp.einsum("bqk,bkd->bqd", p.astype(jnp.bfloat16), vh,
                        preferred_element_type=jnp.float32)             # [B, TL, v]
        z_heads.append(zh)

    # Fused shrink_head: concat heads along lanes -> ONE K = nH*v matmul on the MXU.
    z_cat = jnp.concatenate(z_heads, axis=-1).reshape(BT, num_heads * v_size)
    z0 = jnp.dot(z_cat.astype(jnp.bfloat16), wsh_ref[...],
                 preferred_element_type=jnp.float32) + bsh_ref[...]

    def layer_norm(y, gamma, beta, eps=1e-5):
        mu = jnp.mean(y, axis=-1, keepdims=True)
        var = jnp.mean(jnp.square(y - mu), axis=-1, keepdims=True)
        return (y - mu) * lax.rsqrt(var + eps) * gamma + beta           # rsqrt -> EUP

    z1 = layer_norm(z0 + x2, g1_ref[...], b1_ref[...])

    h1 = jnp.dot(z1.astype(jnp.bfloat16), wf1_ref[...],
                 preferred_element_type=jnp.float32) + bf1_ref[...]
    h1 = jnp.maximum(h1, 0.0)                                           # ReLU
    h2 = jnp.dot(h1.astype(jnp.bfloat16), wf2_ref[...],
                 preferred_element_type=jnp.float32) + bf2_ref[...]

    z3 = layer_norm(z1 + h2, g2_ref[...], b2_ref[...])
    out_ref[...] = z3.reshape(B, TL, H).astype(out_ref.dtype)


# ----------------------------------------------------------------------------- #
# Wrapper: one SelfAttentionEncoderBlock = QKV-projection kernel + attention/FFN kernel
# ----------------------------------------------------------------------------- #
def encoder_block(x, maskcol, p, *, tile_l=None):
    B, L, H = x.shape
    nH, qs, ks, vs = p["num_heads"], p["q_size"], p["k_size"], p["v_size"]
    assert qs == ks, "attention einsum requires q_size == k_size"
    Dq, Dk, Dv = nH * qs, nH * ks, nH * vs

    if tile_l is None:
        tile_l = _choose_tile_l(B, L)
    assert L % tile_l == 0
    assert tile_l == L or tile_l % 16 == 0
    n_tiles = L // tile_l

    cparams = pltpu.CompilerParams(
        dimension_semantics=("parallel",),        # shard query tiles across TCs on v7x
        vmem_limit_bytes=_vmem_limit_bytes(),     # generation-aware scoped-VMEM budget
    )

    # --- Kernel A: fused Q/K/V projection (one wide matmul), lane-dense bf16 outputs ---
    q_all, k_all, v_all = pl.pallas_call(
        qkv_proj_kernel,
        out_shape=(jax.ShapeDtypeStruct((B, L, Dq), jnp.bfloat16),
                   jax.ShapeDtypeStruct((B, L, Dk), jnp.bfloat16),
                   jax.ShapeDtypeStruct((B, L, Dv), jnp.bfloat16)),
        grid=(n_tiles,),
        in_specs=[
            pl.BlockSpec((B, tile_l, H), lambda i: (0, i, 0)),
            pl.BlockSpec((H, Dq + Dk + Dv), lambda i: (0, 0)),
            pl.BlockSpec((1, Dq + Dk + Dv), lambda i: (0, 0)),
        ],
        out_specs=(
            pl.BlockSpec((B, tile_l, Dq), lambda i: (0, i, 0)),
            pl.BlockSpec((B, tile_l, Dk), lambda i: (0, i, 0)),
            pl.BlockSpec((B, tile_l, Dv), lambda i: (0, i, 0)),
        ),
        compiler_params=cparams,
    )(x, p["wqkv"], p["bqkv"])

    # --- Kernel B: attention + shrink_head + LN + FFN + LN, tiled over query rows ---
    # NOTE: softmax is over the batch axis (faithful to the reference), so we tile over
    # L (all batches present per tile), never over B. K/V are kept VMEM-resident here.
    # TODO(synk): at production L/H on v7x (64 MiB VMEM) add a key-tile grid axis (safe:
    # softmax is over batch, so key tiling only needs a PV accumulator) or stream K/V.
    kernel = functools.partial(attn_ffn_kernel,
                               num_heads=nH, q_size=qs, k_size=ks, v_size=vs)
    z3 = pl.pallas_call(
        kernel,
        out_shape=jax.ShapeDtypeStruct((B, L, H), jnp.float32),
        grid=(n_tiles,),
        in_specs=[
            pl.BlockSpec((B, tile_l, H), lambda i: (0, i, 0)),      # x tile (residual)
            pl.BlockSpec((B, L), lambda i: (0, 0)),                 # mask column (resident)
            pl.BlockSpec((B, tile_l, Dq), lambda i: (0, i, 0)),     # Q tile (pre-scaled)
            pl.BlockSpec((B, L, Dk), lambda i: (0, 0, 0)),          # K_all (resident)
            pl.BlockSpec((B, L, Dv), lambda i: (0, 0, 0)),          # V_all (resident)
            pl.BlockSpec((Dv, H), lambda i: (0, 0)),                # Wsh (pre-transposed)
            pl.BlockSpec((1, H), lambda i: (0, 0)),                 # bsh
            pl.BlockSpec((1, H), lambda i: (0, 0)),                 # gamma1
            pl.BlockSpec((1, H), lambda i: (0, 0)),                 # beta1
            pl.BlockSpec((H, 4 * H), lambda i: (0, 0)),             # Wf1 (pre-transposed)
            pl.BlockSpec((1, 4 * H), lambda i: (0, 0)),             # bf1
            pl.BlockSpec((4 * H, H), lambda i: (0, 0)),             # Wf2 (pre-transposed)
            pl.BlockSpec((1, H), lambda i: (0, 0)),                 # bf2
            pl.BlockSpec((1, H), lambda i: (0, 0)),                 # gamma2
            pl.BlockSpec((1, H), lambda i: (0, 0)),                 # beta2
        ],
        out_specs=pl.BlockSpec((B, tile_l, H), lambda i: (0, i, 0)),
        compiler_params=cparams,
    )(x, maskcol, q_all, k_all, v_all,
      p["wsh"], p["bsh"],
      p["g1"], p["b1"], p["wf1"], p["bf1"], p["wf2"], p["bf2"],
      p["g2"], p["b2"])
    return z3


# ----------------------------------------------------------------------------- #
# Parameters: nn.Linear-style init, then repacked into TPU-friendly fused layout
# ----------------------------------------------------------------------------- #
def init_block_params(key, hidden, num_heads, q_size, k_size, v_size):
    def linear_init(k, out_dim, in_dim):
        kw, kb = jax.random.split(k)
        bound = 1.0 / math.sqrt(in_dim)
        w = jax.random.uniform(kw, (out_dim, in_dim), jnp.float32, -bound, bound)
        b = jax.random.uniform(kb, (out_dim,), jnp.float32, -bound, bound)
        return w, b

    keys = jax.random.split(key, 3 * num_heads + 3)
    wq_l, bq_l, wk_l, bk_l, wv_l, bv_l = [], [], [], [], [], []
    idx = 0
    for _ in range(num_heads):
        w, b = linear_init(keys[idx], q_size, hidden); wq_l.append(w); bq_l.append(b); idx += 1
        w, b = linear_init(keys[idx], k_size, hidden); wk_l.append(w); bk_l.append(b); idx += 1
        w, b = linear_init(keys[idx], v_size, hidden); wv_l.append(w); bv_l.append(b); idx += 1
    wsh, bsh = linear_init(keys[idx], hidden, num_heads * v_size); idx += 1
    wf1, bf1 = linear_init(keys[idx], 4 * hidden, hidden); idx += 1
    wf2, bf2 = linear_init(keys[idx], hidden, 4 * hidden); idx += 1

    # Repack: pre-transpose everything to [in, out]; fuse Q|K|V head-major into ONE
    # weight; fold 1/sqrt(dk) into the Q portion; matmul weights bf16, biases/LN f32.
    scale = 1.0 / math.sqrt(k_size)
    wqkv = jnp.concatenate([w.T * scale for w in wq_l]
                           + [w.T for w in wk_l]
                           + [w.T for w in wv_l], axis=1)          # [H, nH*(q+k+v)]
    bqkv = jnp.concatenate([b * scale for b in bq_l] + bk_l + bv_l)[None, :]

    return dict(
        num_heads=num_heads, q_size=q_size, k_size=k_size, v_size=v_size,
        wqkv=wqkv.astype(jnp.bfloat16), bqkv=bqkv,
        wsh=wsh.T.astype(jnp.bfloat16), bsh=bsh[None, :],
        g1=jnp.ones((1, hidden), jnp.float32), b1=jnp.zeros((1, hidden), jnp.float32),
        wf1=wf1.T.astype(jnp.bfloat16), bf1=bf1[None, :],
        wf2=wf2.T.astype(jnp.bfloat16), bf2=bf2[None, :],
        g2=jnp.ones((1, hidden), jnp.float32), b2=jnp.zeros((1, hidden), jnp.float32),
    )


def make_positional_encodings(max_len, hidden):
    # pe[pos, i]   = sin(pos / 10000**(2*i/H))      for even i
    # pe[pos, i+1] = cos(pos / 10000**(2*(i+1)/H))  (exponents exactly as in the reference)
    pos = jnp.arange(max_len, dtype=jnp.float32)[:, None]
    even_i = jnp.arange(0, hidden, 2, dtype=jnp.float32)[None, :]
    pe_even = jnp.sin(pos / jnp.power(10000.0, 2.0 * even_i / hidden))
    pe_odd = jnp.cos(pos / jnp.power(10000.0, 2.0 * (even_i + 1.0) / hidden))
    pe = jnp.zeros((max_len, hidden), jnp.float32)
    pe = pe.at[:, 0::2].set(pe_even).at[:, 1::2].set(pe_odd)
    return pe


def encoder_forward(tokens, input_lengths, embedding, block_params, max_len, hidden,
                    tile_l=None):
    B, L = tokens.shape
    # TODO(synk): embedding gather + positional-encoding add kept as plain-JAX glue
    # (a per-token gather is not a good fit for a toy-sized Pallas kernel).
    emb = embedding[tokens]                                    # [B, L, H]
    pe = make_positional_encodings(max_len, hidden)[:L, :]
    z = emb + pe[None, :, :]

    lengths = jnp.asarray(input_lengths, dtype=jnp.int32)
    maskcol = (jnp.arange(L)[None, :] < lengths[:, None]).astype(jnp.float32)  # [B, L]

    for p in block_params:
        z = encoder_block(z, maskcol, p, tile_l=tile_l)

    # h_n = z[:, 0, :].unsqueeze(0).expand(2, B, H)
    h_n = jnp.broadcast_to(z[:, 0, :][None, :, :], (2, B, hidden))
    # z -> unsqueeze(2).expand(B, L, 2, H).view(B, L, 2H)  (duplicate hidden along last dim)
    z_out = jnp.concatenate([z, z], axis=-1)
    return z_out, h_n


# ----------------------------------------------------------------------------- #
# Main
# ----------------------------------------------------------------------------- #
if __name__ == "__main__":
    # Small but lane-dense shapes (hidden = 128 so last dims are multiples of 128).
    B, L = 2, 8                 # batch, max_len (seq)
    vocab = 50
    hidden = 128
    num_heads = 4
    q_size = k_size = v_size = 32      # nH * v == hidden, as in the module defaults
    num_blocks = 2

    key = jax.random.PRNGKey(0)
    k_emb, k_tok, k_blocks = jax.random.split(key, 3)

    embedding = jax.random.normal(k_emb, (vocab, hidden), jnp.float32)
    tokens = jax.random.randint(k_tok, (B, L), 0, vocab)
    input_lengths = [L, L - 3]

    block_keys = jax.random.split(k_blocks, num_blocks)
    block_params = [
        init_block_params(bk, hidden, num_heads, q_size, k_size, v_size)
        for bk in block_keys
    ]

    z_out, h_n = encoder_forward(tokens, input_lengths, embedding, block_params,
                                 max_len=L, hidden=hidden)
    jax.block_until_ready((z_out, h_n))

    assert z_out.shape == (B, L, 2 * hidden), z_out.shape
    assert h_n.shape == (2, B, hidden), h_n.shape
    assert bool(jnp.all(jnp.isfinite(z_out))) and bool(jnp.all(jnp.isfinite(h_n)))
    print("KERNEL_OK")
</pallas_src>

<mosaic_0001>
module attributes {stable_mosaic.version = 11 : i64} {
  func.func @qkv_proj_kernel(%arg0: i32, %arg1: memref<2x8x128xf32, #tpu.memory_space<vmem>>, %arg2: memref<128x384xbf16, #tpu.memory_space<vmem>>, %arg3: memref<1x384xf32, #tpu.memory_space<vmem>>, %arg4: memref<2x8x128xbf16, #tpu.memory_space<vmem>>, %arg5: memref<2x8x128xbf16, #tpu.memory_space<vmem>>, %arg6: memref<2x8x128xbf16, #tpu.memory_space<vmem>>) attributes {dimension_semantics = [#tpu.dimension_semantics<parallel>], iteration_bounds = array<i64: 1>, scalar_prefetch = 0 : i64, scratch_operands = 0 : i64, tpu.core_type = #tpu.core_type<tc>, window_params = [{transform_indices = @transform_0, window_bounds = array<i64: 2, 8, 128>}, {pipeline_mode = #tpu.pipeline_mode<synchronous>, transform_indices = @transform_1, window_bounds = array<i64: 128, 384>}, {pipeline_mode = #tpu.pipeline_mode<synchronous>, transform_indices = @transform_2, window_bounds = array<i64: 1, 384>}, {transform_indices = @transform_3, window_bounds = array<i64: 2, 8, 128>}, {transform_indices = @transform_4, window_bounds = array<i64: 2, 8, 128>}, {transform_indices = @transform_5, window_bounds = array<i64: 2, 8, 128>}]} {
    %c0 = arith.constant 0 : index
    %c0_0 = arith.constant 0 : index
    %c0_1 = arith.constant 0 : index
    %0 = vector.load %arg1[%c0, %c0_0, %c0_1] : memref<2x8x128xf32, #tpu.memory_space<vmem>>, vector<2x8x128xf32>
    %1 = vector.shape_cast %0 : vector<2x8x128xf32> to vector<16x128xf32>
    %2 = arith.truncf %1 : vector<16x128xf32> to vector<16x128xbf16>
    %c0_2 = arith.constant 0 : index
    %c0_3 = arith.constant 0 : index
    %3 = vector.load %arg2[%c0_2, %c0_3] : memref<128x384xbf16, #tpu.memory_space<vmem>>, vector<128x384xbf16>
    %cst = arith.constant dense<0.000000e+00> : vector<16x384xf32>
    %4 = tpu.matmul %2, %3, %cst {dimension_numbers = #tpu.dot_dimension_numbers<[1], [0], [0], [1], [0, 0, 1, 1], [], []>} : vector<16x128xbf16>, vector<128x384xbf16>, vector<16x384xf32> -> vector<16x384xf32>
    %c0_4 = arith.constant 0 : index
    %c0_5 = arith.constant 0 : index
    %5 = vector.load %arg3[%c0_4, %c0_5] : memref<1x384xf32, #tpu.memory_space<vmem>>, vector<1x384xf32>
    %6 = vector.broadcast %5 : vector<1x384xf32> to vector<16x384xf32>
    %7 = arith.addf %4, %6 : vector<16x384xf32>
    %8 = vector.extract_strided_slice %7 {offsets = [0, 0], sizes = [16, 128], strides = [1, 1]} : vector<16x384xf32> to vector<16x128xf32>
    %9 = vector.shape_cast %8 : vector<16x128xf32> to vector<2x8x128xf32>
    %10 = arith.truncf %9 : vector<2x8x128xf32> to vector<2x8x128xbf16>
    %c0_6 = arith.constant 0 : index
    %c0_7 = arith.constant 0 : index
    %c0_8 = arith.constant 0 : index
    %11 = vector.load %arg4[%c0_6, %c0_7, %c0_8] : memref<2x8x128xbf16, #tpu.memory_space<vmem>>, vector<2x8x128xbf16>
    tpu.vector_store %arg4[%c0_6, %c0_7, %c0_8], %10 {strides = array<i32>} : memref<2x8x128xbf16, #tpu.memory_space<vmem>>, vector<2x8x128xbf16>,
    %12 = vector.extract_strided_slice %7 {offsets = [0, 128], sizes = [16, 128], strides = [1, 1]} : vector<16x384xf32> to vector<16x128xf32>
    %13 = vector.shape_cast %12 : vector<16x128xf32> to vector<2x8x128xf32>
    %14 = arith.truncf %13 : vector<2x8x128xf32> to vector<2x8x128xbf16>
    %c0_9 = arith.constant 0 : index
    %c0_10 = arith.constant 0 : index
    %c0_11 = arith.constant 0 : index
    %15 = vector.load %arg5[%c0_9, %c0_10, %c0_11] : memref<2x8x128xbf16, #tpu.memory_space<vmem>>, vector<2x8x128xbf16>
    tpu.vector_store %arg5[%c0_9, %c0_10, %c0_11], %14 {strides = array<i32>} : memref<2x8x128xbf16, #tpu.memory_space<vmem>>, vector<2x8x128xbf16>,
    %16 = vector.extract_strided_slice %7 {offsets = [0, 256], sizes = [16, 128], strides = [1, 1]} : vector<16x384xf32> to vector<16x128xf32>
    %17 = vector.shape_cast %16 : vector<16x128xf32> to vector<2x8x128xf32>
    %18 = arith.truncf %17 : vector<2x8x128xf32> to vector<2x8x128xbf16>
    %c0_12 = arith.constant 0 : index
    %c0_13 = arith.constant 0 : index
    %c0_14 = arith.constant 0 : index
    %19 = vector.load %arg6[%c0_12, %c0_13, %c0_14] : memref<2x8x128xbf16, #tpu.memory_space<vmem>>, vector<2x8x128xbf16>
    tpu.vector_store %arg6[%c0_12, %c0_13, %c0_14], %18 {strides = array<i32>} : memref<2x8x128xbf16, #tpu.memory_space<vmem>>, vector<2x8x128xbf16>,
    return
  }
  func.func @transform_0(%arg0: i32) -> (i32, i32, i32) {
    %c0_i32 = arith.constant 0 : i32
    %c0_i32_0 = arith.constant 0 : i32
    %c0_i32_1 = arith.constant 0 : i32
    return %c0_i32, %arg0, %c0_i32_0 : i32, i32, i32
  }
  func.func @transform_1(%arg0: i32) -> (i32, i32) {
    %c0_i32 = arith.constant 0 : i32
    %c0_i32_0 = arith.constant 0 : i32
    %c0_i32_1 = arith.constant 0 : i32
    return %c0_i32, %c0_i32_0 : i32, i32
  }
  func.func @transform_2(%arg0: i32) -> (i32, i32) {
    %c0_i32 = arith.constant 0 : i32
    %c0_i32_0 = arith.constant 0 : i32
    %c0_i32_1 = arith.constant 0 : i32
    return %c0_i32, %c0_i32_0 : i32, i32
  }
  func.func @transform_3(%arg0: i32) -> (i32, i32, i32) {
    %c0_i32 = arith.constant 0 : i32
    %c0_i32_0 = arith.constant 0 : i32
    %c0_i32_1 = arith.constant 0 : i32
    return %c0_i32, %arg0, %c0_i32_0 : i32, i32, i32
  }
  func.func @transform_4(%arg0: i32) -> (i32, i32, i32) {
    %c0_i32 = arith.constant 0 : i32
    %c0_i32_0 = arith.constant 0 : i32
    %c0_i32_1 = arith.constant 0 : i32
    return %c0_i32, %arg0, %c0_i32_0 : i32, i32, i32
  }
  func.func @transform_5(%arg0: i32) -> (i32, i32, i32) {
    %c0_i32 = arith.constant 0 : i32
    %c0_i32_0 = arith.constant 0 : i32
    %c0_i32_1 = arith.constant 0 : i32
    return %c0_i32, %arg0, %c0_i32_0 : i32, i32, i32
  }
}

</mosaic_0001>

<bundles_post_ra>
// kernel: tpu_custom_call.1
= control target key start
LH: loop header
LB: loop body
LE: loop exit
PB: predicated region body
PF: predicated region fallthrough
CT: control target
= control target key end

     0   :  { %11 = vsyncpa [#allocation3], 0  ;;  %s735_s0 = inlined_call_operand.hbm [shape: f32[2,8,128], index: 0, kind: input, shape index: {}]   ;;  %s736_s1 = inlined_call_operand.hbm [shape: bf16[128,384], index: 1, kind: input, shape index: {}]   ;;  %s737_s2 = inlined_call_operand.vmem [shape: f32[1,384], index: 2, kind: input, shape index: {}]   ;;  %s738_s3 = inlined_call_operand.hbm [shape: bf16[2,8,128], index: 3, kind: output, shape index: {0}]   ;;  %s739_s4 = inlined_call_operand.hbm [shape: bf16[2,8,128], index: 4, kind: output, shape index: {1}]   ;;  %s740_s5 = inlined_call_operand.hbm [shape: bf16[2,8,128], index: 5, kind: output, shape index: {2}]  }
   0x1   :  { %12 = vsyncpa [#allocation6], 0 }
   0x2   :  { %13 = vsyncpa [#allocation4], 0 }
   0x3   :  { %14 = vsyncpa [#allocation9], 0  ;;  %s605_s18 = smov [#allocation2]   ;;  %s487_s22 = scalar_lea.hbm %s735_s0, 256 }
   0x4   :  { %s20_s19 = sshll.u32 %s605_s18, 4  ;;  %p488_p0 = scmp.ne.s32.totalorder %s735_s0, %s487_s22  ;;  %s21_s19 = int_to_ptr.vmem [resolvable:$true] %s20_s19 }
   0x5   :  { %p491_p1 = scmp.lt.u32.totalorder %s487_s22, %s735_s0 }
   0x7   :  { %p493_p2 = pnand %p491_p1, %p488_p0 }
   0x9   :  { %496 = shalt.err (!%p493_p2)
}
   0xa   :  { %s497_s27 = scalar_lea.vmem %s21_s19, 256  ;;  %p502_p4 = scmp.lt.s32.totalorder %s21_s19, %s21_s19 }
   0xb   :  { %p498_p3 = scmp.ne.s32.totalorder %s21_s19, %s497_s27  ;;  %p503_p5 = scmp.lt.s32.totalorder %s497_s27, %s497_s27 }
   0xd   :  { %p504_p6 = por %p503_p5, %p502_p4 }
   0xf   :  { %p505_p7 = pnand %p504_p6, %p498_p3 }
  0x11   :  { %508 = shalt.err (!%p505_p7)
}
  0x12   :  { %s606_s28 = smov 128   ;;  %s607_s29 = smov 8  }
  0x13   :  { %26 = dma.hbm_to_vmem [thread:$0]  %s735_s0, 256, %s21_s19, [#allocation3], %s606_s28, %s606_s28, %s607_s29  }
  0x14   :  { %s608_s7 = smov [#allocation5]   ;;  %s509_s11 = scalar_lea.hbm %s736_s1, 3072 }
  0x15   :  { %s32_s8 = sshll.u32 %s608_s7, 4  ;;  %p510_p8 = scmp.ne.s32.totalorder %s736_s1, %s509_s11  ;;  %s33_s8 = int_to_ptr.vmem [resolvable:$true] %s32_s8 }
  0x16   :  { %p513_p9 = scmp.lt.u32.totalorder %s509_s11, %s736_s1 }
  0x18   :  { %p515_p10 = pnand %p513_p9, %p510_p8 }
  0x1a   :  { %518 = shalt.err (!%p515_p10)
}
  0x1b   :  { %s519_s16 = scalar_lea.vmem %s33_s8, 3072  ;;  %p524_p12 = scmp.lt.s32.totalorder %s33_s8, %s33_s8 }
  0x1c   :  { %p520_p11 = scmp.ne.s32.totalorder %s33_s8, %s519_s16  ;;  %p525_p13 = scmp.lt.s32.totalorder %s519_s16, %s519_s16 }
  0x1e   :  { %p526_p0 = por %p525_p13, %p524_p12 }
  0x20   :  { %p527_p1 = pnand %p526_p0, %p520_p11 }
  0x22   :  { %530 = shalt.err (!%p527_p1)
}
  0x23   :  { %s609_s0 = smov 192   ;;  %s610_s17 = smov 12  }
  0x24   :  { %38 = dma.hbm_to_vmem [thread:$0]  %s736_s1, 3072, %s33_s8, [#allocation6], %s609_s0, %s609_s0, %s610_s17  }
  0x25   :  { %597 = dma.done.wait [#allocation3], 256  }
  0x26   :  { %598 = vsyncadd [#allocation3], 4294967040 }
  0x27   :  { %599 = dma.done.wait [#allocation6], 3072  }
  0x28   :  { %600 = vsyncadd [#allocation6], 4294964224  ;;  %v611_v0 = vmov 0.0   ;;  %vm612_vm0 = vmmov 0   ;;  %v613_v1 = vmov 0   ;;  %v48_v25 = vld [vmem:[#allocation2] sm:$0xff]  ;;  %v85_v29 = vlaneseq }
  0x29   :  { %421 = vmatprep.subr.bf16.mxu1 %v611_v0  ;;  %437 = vmatprep.mubr.msk.bf16.mxu1 %vm612_vm0, %v611_v0  ;;  %v455_v2 = vld [vmem:[#allocation5 + $0x4] ss:$12 sps:$4 sm:$0xff]   ;;  %v457_v3 = vld [vmem:[#allocation5 + $0x8] ss:$12 sps:$4 sm:$0xff]   ;;  %v458_v4 = vld [vmem:[#allocation5] ss:$12 sps:$4 sm:$0xff]  }
  0x2a   :  { %260 = vmatprep.mubr.bf16.mxu0 %v613_v1  ;;  %228 = vmatprep.subr.bf16.mxu0 %v455_v2  ;;  %v459_v5 = vld [vmem:[#allocation5 + $0x1c] ss:$12 sps:$4 sm:$0xff]   ;;  %v461_v6 = vld [vmem:[#allocation5 + $0x20] ss:$12 sps:$4 sm:$0xff]   ;;  %v462_v7 = vld [vmem:[#allocation5 + $0x18] ss:$12 sps:$4 sm:$0xff]  }
  0x2b   :  { %422 = vmatpush3.bf16.msra.mxu1 %v457_v3  ;;  %229 = vmatpush1.bf16.msra.mxu0 %v458_v4  ;;  %v463_v8 = vld [vmem:[#allocation5 + $0x34] ss:$12 sps:$4 sm:$0xff]   ;;  %v465_v9 = vld [vmem:[#allocation5 + $0x38] ss:$12 sps:$4 sm:$0xff]   ;;  %v466_v10 = vld [vmem:[#allocation5 + $0x30] ss:$12 sps:$4 sm:$0xff]  }
  0x2c   :  { %423 = vmatprep.subr.bf16.mxu1 %v611_v0  ;;  %230 = vmatprep.subr.bf16.mxu0 %v459_v5  ;;  %v467_v11 = vld [vmem:[#allocation5 + $0x4c] ss:$12 sps:$4 sm:$0xff]   ;;  %v469_v12 = vld [vmem:[#allocation5 + $0x50] ss:$12 sps:$4 sm:$0xff]   ;;  %v470_v13 = vld [vmem:[#allocation5 + $0x48] ss:$12 sps:$4 sm:$0xff]  }
  0x2d   :  { %v471_v14 = vld [vmem:[#allocation5 + $0x64] ss:$12 sps:$4 sm:$0xff]   ;;  %v473_v15 = vld [vmem:[#allocation5 + $0x68] ss:$12 sps:$4 sm:$0xff]   ;;  %v474_v16 = vld [vmem:[#allocation5 + $0x60] ss:$12 sps:$4 sm:$0xff]  }
  0x2e   :  { %v475_v17 = vld [vmem:[#allocation5 + $0x7c] ss:$12 sps:$4 sm:$0xff]   ;;  %v477_v18 = vld [vmem:[#allocation5 + $0x80] ss:$12 sps:$4 sm:$0xff]   ;;  %v478_v19 = vld [vmem:[#allocation5 + $0x78] ss:$12 sps:$4 sm:$0xff]  }
  0x2f   :  { %424 = vmatpush3.bf16.msra.mxu1 %v461_v6  ;;  %231 = vmatpush1.bf16.msra.mxu0 %v462_v7  ;;  %v479_v20 = vld [vmem:[#allocation5 + $0x94] ss:$12 sps:$4 sm:$0xff]   ;;  %v481_v21 = vld [vmem:[#allocation5 + $0x98] ss:$12 sps:$4 sm:$0xff]   ;;  %v482_v22 = vld [vmem:[#allocation5 + $0x90] ss:$12 sps:$4 sm:$0xff]  }
  0x30   :  { %425 = vmatprep.subr.bf16.mxu1 %v611_v0  ;;  %232 = vmatprep.subr.bf16.mxu0 %v463_v8  ;;  %v483_v23 = vld [vmem:[#allocation5 + $0xac] ss:$12 sps:$4 sm:$0xff]   ;;  %v485_v24 = vld [vmem:[#allocation5 + $0xb0] ss:$12 sps:$4 sm:$0xff]   ;;  %v486_v27 = vld [vmem:[#allocation5 + $0xa8] ss:$12 sps:$4 sm:$0xff]  }
  0x31   :  { %v49_v26 = vld [vmem:[#allocation2 + $0x8] sm:$0xff]  ;;  %v86_v30 = vshrl.u32 %v85_v29, 7  ;;  %v83_v32 = vld [vmem:[%s737_s2] sm:$0x7]  ;;  %s614_s21 = smov [#allocation7]   ;;  %s615_s2 = smov [#allocation8]  }
  0x32   :  { %v50_v28 = vpack.c.bf16 %v49_v26, %v48_v25  ;;  %s329_s22 = sshll.u32 %s614_s21, 4  ;;  %s341_s23 = sshll.u32 %s615_s2, 4  ;;  %s330_s22 = int_to_ptr.vmem [resolvable:$true] %s329_s22  ;;  %s676_s23 = int_to_ptr.vmem [resolvable:$true] %s341_s23 }
  0x33   :  { %426 = vmatpush3.bf16.msra.mxu1 %v465_v9  ;;  %233 = vmatpush1.bf16.msra.mxu0 %v466_v10  ;;  %v95_v31 = vsub.s32 2, %v86_v30  ;;  %v87_v33 = vsub.s32 0, %v86_v30  ;;  %v91_v35 = vsub.s32 1, %v86_v30  ;;  %s616_s24 = smov [#allocation10]   ;;  %s531_s26 = scalar_lea.vmem %s330_s22, 128 }
  0x34   :  { %427 = vmatprep.subr.bf16.mxu1 %v611_v0  ;;  %234 = vmatprep.subr.bf16.mxu0 %v467_v11  ;;  %s353_s25 = sshll.u32 %s616_s24, 4  ;;  %p532_p2 = scmp.ne.s32.totalorder %s330_s22, %s531_s26  ;;  %s678_s25 = int_to_ptr.vmem [resolvable:$true] %s353_s25 }
  0x35   :  { %v96_v34 = vrot.slane %v83_v32, %v95_v31  ;;  %v88_v37 = vrot.slane %v83_v32, %v87_v33  ;;  %v92_v41 = vrot.slane %v83_v32, %v91_v35  ;;  %p536_p3 = scmp.lt.s32.totalorder %s330_s22, %s330_s22  ;;  %p537_p4 = scmp.lt.s32.totalorder %s531_s26, %s531_s26 }
  0x37   :  { %428 = vmatpush3.bf16.msra.mxu1 %v469_v12  ;;  %235 = vmatpush1.bf16.msra.mxu0 %v470_v13  ;;  %p538_p5 = por %p537_p4, %p536_p3 }
  0x38   :  { %429 = vmatprep.subr.bf16.mxu1 %v611_v0  ;;  %236 = vmatprep.subr.bf16.mxu0 %v471_v14 }
  0x39   :  { %p539_p6 = pnand %p538_p5, %p532_p2 }
  0x3b   :  { %430 = vmatpush3.bf16.msra.mxu1 %v473_v15  ;;  %237 = vmatpush1.bf16.msra.mxu0 %v474_v16 }
  0x3c   :  { %431 = vmatprep.subr.bf16.mxu1 %v611_v0  ;;  %238 = vmatprep.subr.bf16.mxu0 %v475_v17 }
  0x3f   :  { %432 = vmatpush3.bf16.msra.mxu1 %v477_v18  ;;  %239 = vmatpush1.bf16.msra.mxu0 %v478_v19 }
  0x40   :  { %433 = vmatprep.subr.bf16.mxu1 %v611_v0  ;;  %240 = vmatprep.subr.bf16.mxu0 %v479_v20 }
  0x43   :  { %434 = vmatpush3.bf16.msra.mxu1 %v481_v21  ;;  %241 = vmatpush1.bf16.msra.mxu0 %v482_v22 }
  0x44   :  { %435 = vmatprep.subr.bf16.mxu1 %v611_v0  ;;  %242 = vmatprep.subr.bf16.mxu0 %v483_v23 }
  0x47   :  { %436 = vmatpush3.bf16.msra.mxu1 %v485_v24  ;;  %243 = vmatpush1.bf16.msra.mxu0 %v486_v27 }
  0x4a   :  { %438 = vmatmul.mubr.bf16.vlgmr.msra.gmra.mrb[0].mxu1 %v50_v28  ;;  %261 = vmatmul.mubr.bf16.vlgmr.msra.gmra.mrb[0].mxu0 %v50_v28 }
 0x11d   :  { %v305_v36 = vpop.f32.mrb[0].mxu1  ;;  %v262_v39 = vpop.f32.mrb[0].mxu0 }
 0x11e   :  { %v306_v38 = vadd.f32 %v305_v36, %v96_v34  ;;  %v439_v40 = vpop.f32.mrb[1].mxu1  ;;  %v264_v42 = vpop.f32.mrb[1].mxu0  ;;  %v263_v47 = vadd.f32 %v262_v39, %v88_v37 }
 0x11f   :  { %v308_v43 = vpop.f32.mrb[2].mxu1  ;;  %v266_v45 = vpop.f32.mrb[2].mxu0  ;;  %v265_v50 = vadd.f32 %v264_v42, %v92_v41 }
 0x120   :  { %v309_v44 = vadd.f32 %v308_v43, %v96_v34  ;;  %v440_v46 = vpop.f32.mrb[3].mxu1  ;;  %v267_v48 = vadd.f32 %v266_v45, %v88_v37  ;;  %v268_v49 = vpop.f32.mrb[3].mxu0 }
 0x121   :  { %v269_v52 = vadd.f32 %v268_v49, %v92_v41 }
 0x122   :  { %v410_v51 = vpack.c.bf16 %v309_v44, %v306_v38  ;;  %v400_v53 = vpack.c.bf16 %v267_v48, %v263_v47 }
 0x123   :  { %v405_v54 = vpack.c.bf16 %v269_v52, %v265_v50 }
 0x124   :  { %411 = vst [vmem:[#allocation10] sm:$0xff] %v410_v51   ;;  %401 = vst [vmem:[#allocation7] sm:$0xff] %v400_v53  }
 0x125   :  { %406 = vst [vmem:[#allocation8] sm:$0xff] %v405_v54  }
 0x126   :  { %542 = shalt.err (!%p539_p6)
}
 0x127   :  { %s543_s29 = scalar_lea.hbm %s738_s3, 128 }
 0x128   :  { %p544_p7 = scmp.ne.s32.totalorder %s738_s3, %s543_s29  ;;  %p547_p8 = scmp.lt.u32.totalorder %s543_s29, %s738_s3 }
 0x12a   :  { %p549_p9 = pnand %p547_p8, %p544_p7 }
 0x12c   :  { %552 = shalt.err (!%p549_p9)
}
 0x12d   :  { %s617_s9 = smov 64   ;;  %s618_s10 = smov 4  }
 0x12e   :  { %335 = dma.vmem_to_hbm [thread:$0]  %s330_s22, 128, %s738_s3, [#allocation4], %s617_s9, %s617_s9, %s618_s10  }
 0x12f   :  { %s553_s13 = scalar_lea.vmem %s676_s23, 128  ;;  %p558_p11 = scmp.lt.s32.totalorder %s676_s23, %s676_s23 }
 0x130   :  { %p554_p10 = scmp.ne.s32.totalorder %s676_s23, %s553_s13  ;;  %p559_p12 = scmp.lt.s32.totalorder %s553_s13, %s553_s13 }
 0x132   :  { %p560_p13 = por %p559_p12, %p558_p11 }
 0x134   :  { %p561_p0 = pnand %p560_p13, %p554_p10 }
 0x136   :  { %564 = shalt.err (!%p561_p0)
}
 0x137   :  { %s565_s16 = scalar_lea.hbm %s739_s4, 128 }
 0x138   :  { %p566_p1 = scmp.ne.s32.totalorder %s739_s4, %s565_s16  ;;  %p569_p2 = scmp.lt.u32.totalorder %s565_s16, %s739_s4 }
 0x13a   :  { %p571_p3 = pnand %p569_p2, %p566_p1 }
 0x13c   :  { %574 = shalt.err (!%p571_p3)
}
 0x13d   :  { %347 = dma.vmem_to_hbm [thread:$0]  %s676_s23, 128, %s739_s4, [#allocation9], %s617_s9, %s617_s9, %s618_s10  }
 0x13e   :  { %s575_s20 = scalar_lea.vmem %s678_s25, 128  ;;  %p580_p5 = scmp.lt.s32.totalorder %s678_s25, %s678_s25 }
 0x13f   :  { %p576_p4 = scmp.ne.s32.totalorder %s678_s25, %s575_s20  ;;  %p581_p6 = scmp.lt.s32.totalorder %s575_s20, %s575_s20 }
 0x141   :  { %p582_p7 = por %p581_p6, %p580_p5 }
 0x143   :  { %p583_p8 = pnand %p582_p7, %p576_p4 }
 0x145   :  { %586 = shalt.err (!%p583_p8)
}
 0x146   :  { %s587_s2 = scalar_lea.hbm %s740_s5, 128 }
 0x147   :  { %p588_p9 = scmp.ne.s32.totalorder %s740_s5, %s587_s2  ;;  %p591_p10 = scmp.lt.u32.totalorder %s587_s2, %s740_s5 }
 0x149   :  { %p593_p11 = pnand %p591_p10, %p588_p9 }
 0x14b   :  { %596 = shalt.err (!%p593_p11)
}
 0x14c   :  { %359 = dma.vmem_to_hbm [thread:$0]  %s678_s25, 128, %s740_s5, [#allocation9], %s617_s9, %s617_s9, %s618_s10  }
 0x14d   :  { %601 = dma.done.wait [#allocation4], 128  }
 0x14e   :  { %602 = vsyncadd [#allocation4], 4294967168 }
 0x14f   :  { %603 = dma.done.wait [#allocation9], 256  }
 0x150   :  { %604 = vsyncadd [#allocation9], 4294967040 }
 0x151   :  { %369 = vsyncpa [#allocation3], 1 }
 0x152   :  { %370 = vsyncpa [#allocation6], 1 }
 0x153   :  { %371 = vsyncpa [#allocation4], 1 }
 0x154   :  { %372 = vsyncpa [#allocation9], 1 }

</bundles_post_ra>
